<compile_context>
chip_gen: v5e
topology: v5e:2x2
jax: 0.10.0
libtpu: 0.0.40
codegen_flags: <defaults>
</compile_context>

<pallas_src>
import jax
import jax.numpy as jnp
import numpy as np
from jax.experimental import pallas as pl
from jax.experimental.pallas import tpu as pltpu

_HAS_TPU_RNG = hasattr(pltpu, "prng_seed") and hasattr(pltpu, "prng_random_bits")


def _round_up(n, m):
    return ((n + m - 1) // m) * m


def _pick_tile(n, unit, cap):
    """Largest multiple of `unit` that divides n and is <= max(cap, unit)."""
    cap = max(cap, unit)
    best = unit
    t = unit
    while t <= min(n, cap):
        if n % t == 0:
            best = t
        t += unit
    return best


def _vmem_config():
    """(block_cap_bytes, vmem_limit_bytes), sized per TPU generation."""
    phys = None
    try:
        if jax.default_backend() == "tpu" and hasattr(pltpu, "get_tpu_info"):
            phys = int(pltpu.get_tpu_info().vmem_capacity_bytes)
    except Exception:
        phys = None
    if phys is None:
        phys = 64 << 20  # conservative (v7x-sized) default
    if phys <= (64 << 20):
        # v7x: 64 MiB physical per TensorCore -> keep blocks ~4 MiB,
        # scoped VMEM <= 48 MiB (room for ~7 block-sized live buffers).
        return 4 << 20, 48 << 20
    # v5e / v6e: 128 MiB physical -> ~8 MiB blocks, raise scoped limit.
    return 8 << 20, 96 << 20


def _mh_kernel_fused_rng(seed_ref, z_ref, scale_ref, o_ref):
    """z + scale * N(0,1) with in-kernel Box-Muller RNG (real TPU only)."""
    dj = pl.program_id(0)
    bi = pl.program_id(1)
    # Multi-word seed: stream depends on (base_seed, tile coords) jointly,
    # so (seed, tile) pairs never alias the way seed + tile_id did.
    pltpu.prng_seed(seed_ref[0], dj, bi)
    shape = z_ref.shape
    bits1 = pltpu.prng_random_bits(shape)
    bits2 = pltpu.prng_random_bits(shape)
    # 23-bit uniforms: u1 in (0, 1) strictly (safe for log), u2 in [0, 1).
    u1 = ((bits1 & 0x7FFFFF).astype(jnp.float32) + 0.5) * (1.0 / 8388608.0)
    u2 = (bits2 & 0x7FFFFF).astype(jnp.float32) * (1.0 / 8388608.0)
    # Box-Muller: exact standard normal.  log/sqrt/cos ride the EUP slot.
    r = jnp.sqrt(-2.0 * jnp.log(u1))
    eps = r * jnp.cos(6.283185307179586 * u2)
    zf = z_ref[...].astype(jnp.float32)
    sf = scale_ref[...].astype(jnp.float32)  # (1, td) broadcasts over sublanes
    o_ref[...] = (zf + sf * eps).astype(o_ref.dtype)


def _mh_kernel_ext_eps(seed_ref, z_ref, eps_ref, scale_ref, o_ref):
    """Fallback (CPU / interpret / no-TPU-RNG builds): noise streamed in."""
    del seed_ref
    zf = z_ref[...].astype(jnp.float32)
    ef = eps_ref[...].astype(jnp.float32)
    sf = scale_ref[...].astype(jnp.float32)
    o_ref[...] = (zf + sf * ef).astype(o_ref.dtype)


def mh_proposal_forward(z_nchw, scale, seed):
    """Symmetric Gaussian random-walk MH proposal.

    Returns (z_proposal [B,C,H,W], log p(z|z_) - log p(z_|z) [B]) — the latter
    is exactly zero for this symmetric proposal.
    """
    B, C, H, W = z_nchw.shape
    D = C * H * W
    dtype = z_nchw.dtype
    itemsize = jnp.dtype(dtype).itemsize

    # dtype-aware sublane unit: 8 for f32, 16 for bf16, 32 for 8-bit.
    sub_unit = max(8, 32 // itemsize)
    Bp = _round_up(B, sub_unit)
    Dp = _round_up(D, 128)

    # Features -> lanes; pad to aligned (Bp, Dp) so every block is lane-dense.
    z = z_nchw.reshape(B, D)
    z_pad = jnp.pad(z, ((0, Bp - B), (0, Dp - D)))

    # Accept scalar, per-channel (C,) or per-dimension (D,) scale.
    scale_arr = jnp.asarray(scale, dtype=dtype).reshape(-1)
    if scale_arr.size == 1:
        scale_d = jnp.broadcast_to(scale_arr, (D,))
    elif scale_arr.size == C:
        scale_d = jnp.broadcast_to(scale_arr[:, None], (C, H * W)).reshape(D)
    elif scale_arr.size == D:
        scale_d = scale_arr
    else:
        raise ValueError(f"scale must have 1, {C} or {D} elements")
    scale2d = jnp.pad(scale_d.reshape(1, D), ((0, 0), (0, Dp - D)))

    # Generation-aware tile sizing (pure HBM-streaming kernel: bigger tiles ->
    # fewer ~0.35us grid steps, up to the per-generation VMEM budget).
    block_cap_bytes, vmem_limit = _vmem_config()
    tb = _pick_tile(Bp, sub_unit, 512)
    td_cap = max(128, block_cap_bytes // (tb * itemsize))
    td = _pick_tile(Dp, 128, td_cap)

    # Guarantee >= 2 parallel grid steps where possible so both v7x
    # TensorCores get work (prefer splitting D: keeps lane-dense blocks).
    if (Bp // tb) * (Dp // td) < 2:
        if Dp // max(td // 2, 128) >= 2:
            td = _pick_tile(Dp, 128, max(td // 2, 128))
        elif Bp // max(tb // 2, sub_unit) >= 2:
            tb = _pick_tile(Bp, sub_unit, max(tb // 2, sub_unit))
    nd, nb = Dp // td, Bp // tb
    grid = (nd, nb)  # D outermost: scale block index constant across inner axis

    seed_arr = jnp.asarray([seed], dtype=jnp.int32)

    z_spec = pl.BlockSpec((tb, td), lambda dj, bi, s: (bi, dj))
    s_spec = pl.BlockSpec((1, td), lambda dj, bi, s: (0, dj))

    use_fused = _HAS_TPU_RNG and jax.default_backend() == "tpu"
    if use_fused:
        kernel = _mh_kernel_fused_rng
        in_specs = [z_spec, s_spec]
        operands = (seed_arr, z_pad, scale2d)
        cost = pl.CostEstimate(
            flops=int(12 * Bp * Dp),
            transcendentals=int(3 * Bp * Dp),           # log, cos, sqrt
            bytes_accessed=int(2 * Bp * Dp * itemsize + Dp * itemsize),
        )
    else:
        # TODO(synk): in-kernel TPU RNG unavailable on this backend/build;
        # streaming host-generated noise instead (one extra HBM stream).
        kernel = _mh_kernel_ext_eps
        eps = jax.random.normal(jax.random.PRNGKey(seed), (Bp, Dp),
                                dtype=jnp.float32).astype(dtype)
        in_specs = [z_spec, z_spec, s_spec]
        operands = (seed_arr, z_pad, eps, scale2d)
        cost = pl.CostEstimate(
            flops=int(2 * Bp * Dp),
            transcendentals=0,
            bytes_accessed=int(3 * Bp * Dp * itemsize + Dp * itemsize),
        )

    z_prop_pad = pl.pallas_call(
        kernel,
        out_shape=jax.ShapeDtypeStruct((Bp, Dp), dtype),
        grid_spec=pltpu.PrefetchScalarGridSpec(
            num_scalar_prefetch=1,
            grid=grid,
            in_specs=in_specs,
            out_specs=z_spec,
        ),
        compiler_params=pltpu.CompilerParams(
            dimension_semantics=("parallel", "parallel"),
            vmem_limit_bytes=int(vmem_limit),
        ),
        cost_estimate=cost,
    )(*operands)

    z_prop = z_prop_pad[:B, :D].reshape(B, C, H, W)
    # Symmetric proposal: log p(z | z_) - log p(z_ | z) == 0 exactly.
    log_diff = jnp.zeros((B,), dtype=dtype)
    return z_prop, log_diff


if __name__ == "__main__":
    key = jax.random.PRNGKey(0)
    B, C, H, W = 2, 4, 16, 16
    D = C * H * W

    # Previous samples z (NCHW, as in PyTorch) and per-dimension proposal scale.
    z = jax.random.normal(key, (B, C, H, W), dtype=jnp.float32)
    scale = jnp.full((D,), 0.1, dtype=jnp.float32)
    seed = 1234

    z_prop, log_diff = mh_proposal_forward(z, scale, seed)
    jax.block_until_ready((z_prop, log_diff))

    assert z_prop.shape == (B, C, H, W)
    assert log_diff.shape == (B,)

    # Symmetric random-walk proposal -> log-prob ratio is exactly zero.
    np.testing.assert_array_equal(np.asarray(log_diff), np.zeros(B, np.float32))

    # Implied noise eps = (z_ - z) / scale must look standard-normal.
    eps_impl = (np.asarray(z_prop).reshape(B, D) - np.asarray(z).reshape(B, D)) \
        / np.asarray(scale)[None, :]
    assert abs(float(eps_impl.mean())) < 0.15, eps_impl.mean()
    assert 0.8 < float(eps_impl.std()) < 1.2, eps_impl.std()

    # Structural check: same seed, shifted input -> output shifts by exactly 1.
    z_prop_shift, _ = mh_proposal_forward(z + 1.0, scale, seed)
    np.testing.assert_allclose(
        np.asarray(z_prop_shift) - np.asarray(z_prop),
        np.ones((B, C, H, W), np.float32), rtol=0, atol=1e-5)

    print("KERNEL_OK")
</pallas_src>

<mosaic_0001>
module attributes {stable_mosaic.version = 11 : i64} {
  func.func @_mh_kernel_ext_eps(%arg0: i32, %arg1: i32, %arg2: memref<1xi32, #tpu.memory_space<smem>>, %arg3: memref<8x512xf32, #tpu.memory_space<vmem>>, %arg4: memref<8x512xf32, #tpu.memory_space<vmem>>, %arg5: memref<1x512xf32, #tpu.memory_space<vmem>>, %arg6: memref<8x512xf32, #tpu.memory_space<vmem>>) attributes {dimension_semantics = [#tpu.dimension_semantics<parallel>, #tpu.dimension_semantics<parallel>], iteration_bounds = array<i64: 2, 1>, scalar_prefetch = 1 : i64, scratch_operands = 0 : i64, tpu.core_type = #tpu.core_type<tc>, window_params = [{transform_indices = @transform_0, window_bounds = array<i64: 8, 512>}, {transform_indices = @transform_1, window_bounds = array<i64: 8, 512>}, {transform_indices = @transform_2, window_bounds = array<i64: 1, 512>}, {transform_indices = @transform_3, window_bounds = array<i64: 8, 512>}]} {
    %c0 = arith.constant 0 : index
    %c0_0 = arith.constant 0 : index
    %0 = vector.load %arg3[%c0, %c0_0] : memref<8x512xf32, #tpu.memory_space<vmem>>, vector<8x512xf32>
    %c0_1 = arith.constant 0 : index
    %c0_2 = arith.constant 0 : index
    %1 = vector.load %arg4[%c0_1, %c0_2] : memref<8x512xf32, #tpu.memory_space<vmem>>, vector<8x512xf32>
    %c0_3 = arith.constant 0 : index
    %c0_4 = arith.constant 0 : index
    %2 = vector.load %arg5[%c0_3, %c0_4] : memref<1x512xf32, #tpu.memory_space<vmem>>, vector<1x512xf32>
    %3 = vector.broadcast %2 : vector<1x512xf32> to vector<8x512xf32>
    %4 = arith.mulf %3, %1 : vector<8x512xf32>
    %5 = arith.addf %0, %4 : vector<8x512xf32>
    %c0_5 = arith.constant 0 : index
    %c0_6 = arith.constant 0 : index
    %6 = vector.load %arg6[%c0_5, %c0_6] : memref<8x512xf32, #tpu.memory_space<vmem>>, vector<8x512xf32>
    tpu.vector_store %arg6[%c0_5, %c0_6], %5 {strides = array<i32>} : memref<8x512xf32, #tpu.memory_space<vmem>>, vector<8x512xf32>,
    return
  }
  func.func @transform_0(%arg0: i32, %arg1: i32, %arg2: memref<1xi32, #tpu.memory_space<smem>>) -> (i32, i32) {
    %c0_i32 = arith.constant 0 : i32
    return %arg1, %arg0 : i32, i32
  }
  func.func @transform_1(%arg0: i32, %arg1: i32, %arg2: memref<1xi32, #tpu.memory_space<smem>>) -> (i32, i32) {
    %c0_i32 = arith.constant 0 : i32
    return %arg1, %arg0 : i32, i32
  }
  func.func @transform_2(%arg0: i32, %arg1: i32, %arg2: memref<1xi32, #tpu.memory_space<smem>>) -> (i32, i32) {
    %c0_i32 = arith.constant 0 : i32
    %c0_i32_0 = arith.constant 0 : i32
    return %c0_i32, %arg0 : i32, i32
  }
  func.func @transform_3(%arg0: i32, %arg1: i32, %arg2: memref<1xi32, #tpu.memory_space<smem>>) -> (i32, i32) {
    %c0_i32 = arith.constant 0 : i32
    return %arg1, %arg0 : i32, i32
  }
}

</mosaic_0001>

<bundles_post_ra>
// kernel: tpu_custom_call.1
= control target key start
LH: loop header
LB: loop body
LE: loop exit
PB: predicated region body
PF: predicated region fallthrough
CT: control target
= control target key end

     0   :  { %s931_s0 = inlined_call_operand.<no memory space> [shape: s32[1], index: 0, kind: input, shape index: {}]   ;;  %s932_s1 = inlined_call_operand.hbm [shape: f32[8,1024], index: 1, kind: input, shape index: {}]   ;;  %s933_s2 = inlined_call_operand.hbm [shape: f32[8,1024], index: 2, kind: input, shape index: {}]   ;;  %s934_s3 = inlined_call_operand.hbm [shape: f32[1,1024], index: 3, kind: input, shape index: {}]   ;;  %s935_s4 = inlined_call_operand.hbm [shape: f32[8,1024], index: 4, kind: output, shape index: {}]  }
   0x1   :  { %941 = sst [smem:[#allocation19_spill]] %s933_s2 }
   0x2   :  { %10 = vsyncpa [#allocation5], 0 }
   0x3   :  { %12 = vsyncpa [#allocation5 + $0x1], 0 }
   0x4   :  { %13 = vsyncpa [#allocation8], 0 }
   0x5   :  { %15 = vsyncpa [#allocation8 + $0x1], 0 }
   0x6   :  { %16 = vsyncpa [#allocation6], 0 }
   0x7   :  { %18 = vsyncpa [#allocation6 + $0x1], 0  ;;  %s772_s15 = smov 0   ;;  %s774_s0 = smov 0  }
   0x8   :  { %s776_s16 = smov 0   ;;  %s778_s17 = smov 0  }
   0x9   :  { %s780_s18 = smov 0   ;;  %s782_s19 = smov 0  }
   0xa LB: > { %942 = sst [smem:[#allocation14_spill]] %s733_s16  ;;  %s803_s20 = sadd.s32 4294967295, %s745_s19   ;;  %s745_s19 = sphi %s782_s19, %s24_s19   ;;  %s741_s18 = sphi %s780_s18, %s963_s18   ;;  %s737_s17 = sphi %s778_s17, %s962_s17   ;;  %s733_s16 = sphi %s776_s16, %s961_s16   ;;  %s729_s0 = sphi %s774_s0, %s960_s0   ;;  %s725_s15 = sphi %s772_s15, %s959_s15  }
   0xb   : > { %943 = sst [smem:[#allocation15_spill]] %s745_s19  ;;  %s473_s21 = sadd.s32 4294967294, %s745_s19  }
   0xc   : > { %s36_s22 = sadd.s32 1, %s741_s18  ;;  %s45_s23 = sadd.s32 1, %s733_s16 }
   0xd   : > { %p38_p0 = scmp.ge.s32.totalorder %s36_s22, 2  ;;  %p52_p1 = scmp.ne.s32.totalorder %s733_s16, %s729_s0 }
   0xe   : > { %p53_p2 = scmp.eq.s32.totalorder %s745_s19, 0  ;;  %p58_p3 = scmp.ne.s32.totalorder %s729_s0, %s725_s15 }
   0xf   : > { %s965_s22 = smov (%p38_p0, %s36_s22), 0  ;;  %p59_p5 = scmp.eq.s32.totalorder %s803_s20, 0 }
  0x10   : > { %944 = sst [smem:[#allocation16_spill]] %s965_s22  ;;  %p815_p4 = por %p53_p2, %p52_p1 }
  0x11   : > { %s41_s25 = ssub.s32 %s741_s18, %s965_s22  ;;  %p138_p6 = scmp.eq.s32.totalorder %s803_s20, 1 }
  0x12   : > { %p43_p7 = scmp.eq.s32.totalorder %s41_s25, 0  ;;  %p823_p8 = por %p59_p5, %p58_p3 }
  0x13   : > { %p827_p9 = por %p138_p6, %p52_p1  ;;  %p144_p10 = scmp.eq.s32.totalorder %s473_s21, 1 }
  0x14   : > { %s832_s28 = scalar_select %p43_p7, %s733_s16, %s45_s23  }
  0x15   : > { %p834_p11 = por %p144_p10, %p58_p3  ;;  %p475_p12 = scmp.ge.s32.totalorder %s745_s19, 2 }
  0x16   : > { %948 = sst [smem:[#allocation17_spill]] %s832_s28  ;;  %p519_p13 = scmp.lt.s32.totalorder %s745_s19, 2 }
  0x17   : > { %s949_s29 = scalar_select %p834_p11, 1, 0 }
  0x18   : > { %s164_s30 = sand.u32 1, %s733_s16   ;;  %s494_s6 = sshll.u32 %s741_s18, 5 }
  0x19   : > { %950 = sst [smem:[#allocation18_spill]] %s949_s29  ;;  %s476_s5 = sshll.u32 %s164_s30, 5 }
  0x1a   : > { %p844_p0 = pnand %p519_p13, %p815_p4  ;;  %s186_s8 = sand.u32 1, %s745_s19  }
  0x1b   : > { %s952_s2 = sld [smem:[#allocation19_spill]]  ;;  %s190_s13 = scalar_lea.vmem [#allocation7], %s476_s5 }
  0x1c   : > { %s201_s14 = sshll.u32 %s190_s13, 4  ;;  %s187_s21 = scalar_lea.sflag [#allocation8], %s186_s8  ;;  %s202_s14 = int_to_ptr.vmem [resolvable:$true] %s201_s14 }
  0x1d   : > { %p484_p1 = scmp.ge.s32.totalorder %s745_s19, 1  ;;  %p225_p2 = scmp.lt.s32.totalorder %s745_s19, 3 }
  0x1e   : > { %s175_s9 = scalar_lea.hbm %s932_s1, %s494_s6  ;;  %s482_s8 = sshll.u32 %s164_s30, 2 }
  0x1f   : > { %p856_p3 = pnand %p484_p1, %p225_p2  ;;  %s177_s10 = sshll.u32 %s175_s9, 4  ;;  %s178_s10 = int_to_ptr.hbm [resolvable:$true] %s177_s10 }
  0x20   : > { %s212_s19 = scalar_lea.vmem [#allocation9], %s482_s8 }
  0x21   : > { %s197_s11 = scalar_lea.hbm %s952_s2, %s494_s6  ;;  %s165_s2 = scalar_lea.sflag [#allocation5], %s164_s30 }
  0x22   : > { %s199_s12 = sshll.u32 %s197_s11, 4  ;;  %s168_s11 = scalar_lea.vmem [#allocation4], %s476_s5  ;;  %s200_s12 = int_to_ptr.hbm [resolvable:$true] %s199_s12 }
  0x23   : > { %511 = dma.hbm_to_vmem [thread:$0]  (!%p844_p0), %s200_s12, 512, %s202_s14, %s187_s21  }
  0x24   : > { %s179_s13 = sshll.u32 %s168_s11, 4  ;;  %s483_s12 = sshll.u32 %s741_s18, 2  ;;  %s180_s13 = int_to_ptr.vmem [resolvable:$true] %s179_s13 }
  0x25   : > { %508 = dma.hbm_to_vmem [thread:$0]  (!%p844_p0), %s178_s10, 512, %s180_s13, %s165_s2  }
  0x26   : > { %s216_s28 = scalar_lea.hbm %s934_s3, %s483_s12  ;;  %s220_s29 = sshll.u32 %s212_s19, 4  ;;  %s221_s29 = int_to_ptr.vmem [resolvable:$true] %s220_s29 }
  0x27   : > { %s218_s16 = sshll.u32 %s216_s28, 4  ;;  %229 = sbr.rel (%p856_p3) target bundleno = 64 (0x40), region = 32  ;;  %s219_s16 = int_to_ptr.hbm [resolvable:$true] %s218_s16 }
  0x28   : > { %514 = dma.hbm_to_vmem [thread:$0]  (!%p844_p0), %s219_s16, 64, %s221_s29, %s187_s21  }
  0x29   : > { %s874_s5 = sand.u32 (!%p856_p3), 1, %s729_s0  }
  0x2a   : > { %s877_s2 = sshll.u32 (!%p856_p3), %s874_s5, 5  ;;  %s232_s22 = scalar_lea.sflag (!%p856_p3), [#allocation5], %s874_s5 }
  0x2b   : > { %s235_s28 = scalar_lea.vmem (!%p856_p3), [#allocation4], %s877_s2 }
  0x2c   : > { %712 = dma.done.wait (%p823_p8), %s232_s22, 512  }
  0x2d   : > { %714 = vsyncadd (%p823_p8), %s232_s22, 4294966784  ;;  %s241_s16 = sand.u32 1, %s803_s20   ;;  %s245_s29 = scalar_lea.vmem [#allocation7], %s877_s2 }
  0x2e   : > { %s242_s19 = scalar_lea.sflag [#allocation8], %s241_s16 }
  0x2f   : > { %716 = dma.done.wait (%p823_p8), %s242_s19, 576  }
  0x30   : > { %718 = vsyncadd (%p823_p8), %s242_s19, 4294966720  ;;  %s487_s30 = sshll.u32 %s874_s5, 2  ;;  %s496_s6 = sshll.u32 %s737_s17, 5  ;;  %v297_v0 = vld [vmem:[%s245_s29] sm:$0xff]  ;;  %v294_v4 = vld [vmem:[%s235_s28 + $0x8] sm:$0xff] }
  0x31   : > { %s255_s7 = scalar_lea.vmem [#allocation9], %s487_s30  ;;  %v293_v2 = vld [vmem:[%s235_s28] sm:$0xff]  ;;  %v298_v5 = vld [vmem:[%s245_s29 + $0x8] sm:$0xff]  ;;  %v295_v8 = vld [vmem:[%s235_s28 + $0x10] sm:$0xff]  ;;  %s337_s21 = scalar_lea.hbm %s935_s4, %s496_s6 }
  0x32   : > { %v301_v1 = vld [vmem:[%s255_s7] sm:$0xf]  ;;  %v299_v9 = vld [vmem:[%s245_s29 + $0x10] sm:$0xff]  ;;  %v300_v10 = vld [vmem:[%s245_s29 + $0x18] sm:$0xff]  ;;  %s288_s17 = scalar_lea.vmem [#allocation10], %s877_s2  ;;  %s341_s24 = sshll.u32 %s337_s21, 4  ;;  %s342_s24 = int_to_ptr.hbm [resolvable:$true] %s341_s24 }
  0x33   : > { %v303_v3 = vperm.slane %v301_v1, 0  ;;  %v304_v6 = vperm.slane %v301_v1, 1  ;;  %v305_v7 = vperm.slane %v301_v1, 2  ;;  %v306_v11 = vperm.slane %v301_v1, 3  ;;  %v296_v15 = vld [vmem:[%s235_s28 + $0x18] sm:$0xff]  ;;  %s339_s23 = sshll.u32 %s288_s17, 4  ;;  %s340_s23 = int_to_ptr.vmem [resolvable:$true] %s339_s23 }
  0x34   : > { %s324_s25 = scalar_lea.sflag [#allocation6], %s874_s5  ;;  %s673_s9 = sshra.s32 %s342_s24, 4  ;;  %s674_s9 = int_to_ptr.hbm [resolvable:$true] %s673_s9 }
  0x35   : > { %v311_v12 = vmul.f32 %v303_v3, %v297_v0  ;;  %v312_v13 = vmul.f32 %v304_v6, %v298_v5  ;;  %v313_v14 = vmul.f32 %v305_v7, %v299_v9  ;;  %v314_v16 = vmul.f32 %v306_v11, %v300_v10  ;;  %s675_s10 = scalar_lea.hbm %s674_s9, 32  ;;  %s679_s8 = scalar_lea.hbm %s935_s4, 64 }
  0x36   : > { %p676_p4 = scmp.ne.s32.totalorder %s674_s9, %s675_s10  ;;  %p680_p7 = scmp.lt.s32.totalorder %s674_s9, %s935_s4 }
  0x37   : > { %v315_v17 = vadd.f32 %v311_v12, %v293_v2  ;;  %v316_v18 = vadd.f32 %v312_v13, %v294_v4  ;;  %v317_v19 = vadd.f32 %v313_v14, %v295_v8  ;;  %v318_v20 = vadd.f32 %v314_v16, %v296_v15  ;;  %p681_p8 = scmp.lt.s32.totalorder %s679_s8, %s675_s10 }
  0x38   : > { %p677_p5 = pnand %p676_p4, %p827_p9 }
  0x39   : > { %319 = vst [vmem:[%s288_s17] sm:$0xff] %v315_v17  ;;  %p682_p10 = por %p681_p8, %p680_p7 }
  0x3a   : > { %320 = vst [vmem:[%s288_s17 + $0x8] sm:$0xff] %v316_v18  ;;  %p678_p6 = pneg %p677_p5 }
  0x3b   : > { %321 = vst [vmem:[%s288_s17 + $0x10] sm:$0xff] %v317_v19 }
  0x3c   : > { %322 = vst [vmem:[%s288_s17 + $0x18] sm:$0xff] %v318_v20  ;;  %p683_p13 = pnand %p682_p10, %p678_p6 }
  0x3e   : > { %686 = shalt.err (!%p683_p13)
}
  0x3f   : > { %503 = dma.vmem_to_hbm [thread:$0]  (%p827_p9), %s340_s23, 512, %s342_s24, %s324_s25  }
  0x40 PF: > { %s955_s2 = sld [smem:[#allocation15_spill]]  ;;  %s353_s22 = sand.u32 1, %s725_s15  }
  0x41   : > { %p516_p0 = pnand %p475_p12, %p834_p11  ;;  %s354_s28 = scalar_lea.sflag [#allocation6], %s353_s22 }
  0x43   : > { %p517_p1 = pneg %p516_p0 }
  0x45   : > { %720 = dma.done.wait (%p517_p1), %s354_s28, 512  }
  0x46   : > { %722 = vsyncadd (%p517_p1), %s354_s28, 4294966784  ;;  %s24_s19 = sadd.s32 1, %s955_s2   ;;  %s956_s16 = sld [smem:[#allocation14_spill]] }
  0x47   : > { %p21_p2 = scmp.ge.s32.totalorder %s24_s19, 4   ;;  %s957_s29 = sld [smem:[#allocation17_spill]] }
  0x48   : > { %s958_s27 = sld [smem:[#allocation16_spill]]  ;;  %s959_s15 = smov %s729_s0 }
  0x49   : > { %s962_s17 = smov %s741_s18 }
  0x4a   :  { %23 = sbr.rel (!%p21_p2) target bundleno = 10 (0xa), region = 101 }
  0x4c   : > { %s960_s0 = smov %s956_s16 }
  0x4d   : > { %s961_s16 = smov %s957_s29 }
  0x4e   : > { %s963_s18 = smov %s958_s27 }
  0x4f   :  { %360 = vsyncpa [#allocation5], 1 }
  0x50   :  { %362 = vsyncpa [#allocation5 + $0x1], 1 }
  0x51   :  { %363 = vsyncpa [#allocation8], 1 }
  0x52   :  { %365 = vsyncpa [#allocation8 + $0x1], 1 }
  0x53   :  { %366 = vsyncpa [#allocation6], 1 }
  0x54   :  { %368 = vsyncpa [#allocation6 + $0x1], 1 }

</bundles_post_ra>
